<compile_context>
chip_gen: v7x
topology: tpu7x:2x2x1
jax: 0.10.0
libtpu: 0.0.40
codegen_flags: <defaults>
</compile_context>

<pallas_src>
import jax
import jax.numpy as jnp
from jax.experimental import pallas as pl
from jax.experimental.pallas import tpu as pltpu


def _make_tv_kernel(n_planes, block_planes, blocks_per_core, plane_len, w,
                    acc_rows, needs_mask):
    """TV kernel over a (P, L) = (n_planes, plane_len) view of NCHW input."""
    groups = block_planes // acc_rows

    def kernel(x_ref, out_ref, acc_h_ref, acc_w_ref):
        c = pl.program_id(0)          # split index ("parallel", v7x megacore)
        i = pl.program_id(1)          # plane-block index within this split

        @pl.when(i == 0)
        def _init():
            acc_h_ref[...] = jnp.zeros_like(acc_h_ref)
            acc_w_ref[...] = jnp.zeros_like(acc_w_ref)

        x_raw = x_ref[...]            # (block_planes, plane_len), input dtype
        # Cyclic neighbor shift along the flattened plane row:
        #   shift L-w -> vertically adjacent pixel (dh)
        #   shift L-1 -> horizontally adjacent pixel (dw)
        # Roll in the input dtype (halves XLU traffic for bf16); cast to f32 at
        # the subtract. Cyclic wrap terms are removed in the wrapper and the
        # correction is roll-direction-agnostic (squares are symmetric).
        xh = pltpu.roll(x_raw, plane_len - w, axis=1)
        xw = pltpu.roll(x_raw, plane_len - 1, axis=1)
        x = x_raw.astype(jnp.float32)
        dh = xh.astype(jnp.float32) - x
        dw = xw.astype(jnp.float32) - x
        dh2 = dh * dh
        dw2 = dw * dw

        if needs_mask:
            # Fallback path (grid does not tile P exactly, incl. the clamped
            # duplicate block from the 2-way split): zero rows past the valid
            # plane count. jnp.where also neutralizes NaN/Inf garbage rows.
            row = jax.lax.broadcasted_iota(jnp.int32, (block_planes, 1), 0)
            start = (c * blocks_per_core + i) * block_planes
            valid = (start + row) < n_planes
            dh2 = jnp.where(valid, dh2, 0.0)
            dw2 = jnp.where(valid, dw2, 0.0)

        # In-register partial sums over sublane groups -> (acc_rows, L), so the
        # resident accumulators (and their per-step load/store) stay tiny.
        ph = dh2[0:acc_rows, :]
        pw = dw2[0:acc_rows, :]
        for g in range(1, groups):
            ph = ph + dh2[g * acc_rows:(g + 1) * acc_rows, :]
            pw = pw + dw2[g * acc_rows:(g + 1) * acc_rows, :]

        acc_h_ref[...] += ph
        acc_w_ref[...] += pw

        @pl.when(i == pl.num_programs(1) - 1)
        def _finalize():
            out_ref[0:1, :] = jnp.sum(acc_h_ref[...], axis=0, keepdims=True)
            out_ref[1:2, :] = jnp.sum(acc_w_ref[...], axis=0, keepdims=True)

    return kernel


def _pick_block_planes(p, l, itemsize):
    """Plane rows per grid step: ~4 MiB of input, multiple of 8; prefer a
    divisor of p so the kernel needs no validity mask."""
    target_rows = max(1, (4 * 1024 * 1024) // (l * itemsize))
    if target_rows >= p:
        return p                       # full plane axis: always a legal block
    b0 = max(8, (target_rows // 8) * 8)
    cand = b0
    while cand >= 8:                   # search down for a multiple-of-8 divisor
        if p % cand == 0:
            break
        cand -= 8
    if cand >= 8 and p % cand == 0 and cand >= max(8, b0 // 2):
        return cand                    # mask-free tiling, <= 2x more steps
    return b0                          # fallback: masked last / duplicate block


def tv_loss(x, tv_loss_weight=1.0):
    """Total variation loss, matching PyTorch TVLoss.forward semantics (NCHW)."""
    n, c, h, w = x.shape
    p = n * c
    l = h * w
    x2 = x.reshape(p, l)               # contiguous reshape: free in XLA
    itemsize = jnp.dtype(x.dtype).itemsize

    b = _pick_block_planes(p, l, itemsize)
    nb_total = pl.cdiv(p, b)
    n_split = 2 if nb_total >= 2 else 1   # 2-way parallel axis (v7x 2 TCs)
    bpc = pl.cdiv(nb_total, n_split)
    needs_mask = (n_split * bpc * b) != p
    acc_rows = 8 if (b % 8 == 0) else b

    kernel = _make_tv_kernel(p, b, bpc, l, w, acc_rows, needs_mask)

    cost = pl.CostEstimate(
        flops=int(8 * p * l),              # 2 sub + 2 mul + ~4 adds per element
        transcendentals=0,
        bytes_accessed=int(p * l * itemsize + n_split * 2 * l * 4),
    )

    compiler_kwargs = dict(dimension_semantics=("parallel", "arbitrary"))
    # Normal shapes stay ~8-9 MiB double-buffered -> fits every generation's
    # scoped default (16 MiB v5e, 32 MiB v6e/v7x). Safety valve for huge planes,
    # capped below v7x's 64 MiB physical VMEM.
    vmem_est = 2 * b * l * itemsize + 2 * acc_rows * l * 4 + 4 * l * 4
    if vmem_est > 12 * 1024 * 1024:
        compiler_kwargs["vmem_limit_bytes"] = int(
            min(vmem_est + (4 << 20), 48 * 1024 * 1024))

    last_block = nb_total - 1
    out = pl.pallas_call(
        kernel,
        out_shape=jax.ShapeDtypeStruct((n_split, 2, l), jnp.float32),
        grid_spec=pltpu.PrefetchScalarGridSpec(
            num_scalar_prefetch=0,
            grid=(n_split, bpc),
            in_specs=[pl.BlockSpec(
                (b, l),
                # Clamp the last split's overhang block in-bounds; its rows are
                # zeroed by the in-kernel mask (needs_mask covers this case).
                lambda ci, ii: (jnp.minimum(ci * bpc + ii, last_block), 0))],
            out_specs=pl.BlockSpec((None, 2, l), lambda ci, ii: (ci, 0, 0)),
            scratch_shapes=[pltpu.VMEM((acc_rows, l), jnp.float32),
                            pltpu.VMEM((acc_rows, l), jnp.float32)],
        ),
        compiler_params=pltpu.CompilerParams(**compiler_kwargs),
        cost_estimate=cost,
    )(x2)

    # Subtract the cyclic wrap terms the in-kernel rolls added. Slice BEFORE
    # casting so the correction stays O((H+W)/(H*W)) traffic.
    x_top = x[:, :, 0, :].astype(jnp.float32)
    x_bot = x[:, :, h - 1, :].astype(jnp.float32)
    wrap_h = jnp.sum((x_top - x_bot) ** 2)
    col_first = x[:, :, :, 0].astype(jnp.float32)
    col_last = x[:, :, :, w - 1].astype(jnp.float32)
    wrap_w = jnp.sum((jnp.roll(col_first, -1, axis=-1) - col_last) ** 2)

    h_tv = jnp.sum(out[:, 0, :]) - wrap_h
    w_tv = jnp.sum(out[:, 1, :]) - wrap_w

    # Note: h == 1 or w == 1 gives count == 0 (division by zero), exactly like
    # the PyTorch module.
    count_h = c * (h - 1) * w
    count_w = c * h * (w - 1)
    return tv_loss_weight * 2.0 * (h_tv / count_h + w_tv / count_w) / n


def tv_loss_ref(x, tv_loss_weight=1.0):
    """Pure-JAX reference (mirrors the PyTorch forward)."""
    n, c, h, w = x.shape
    count_h = c * (h - 1) * w
    count_w = c * h * (w - 1)
    h_tv = jnp.sum((x[:, :, 1:, :] - x[:, :, :h - 1, :]) ** 2)
    w_tv = jnp.sum((x[:, :, :, 1:] - x[:, :, :, :w - 1]) ** 2)
    return tv_loss_weight * 2.0 * (h_tv / count_h + w_tv / count_w) / n


if __name__ == "__main__":
    key = jax.random.PRNGKey(0)
    # Small NCHW shape consistent with the module's forward.
    x = jax.random.normal(key, (2, 4, 16, 16), dtype=jnp.float32)

    out = tv_loss(x, tv_loss_weight=1.0)
    out = jax.block_until_ready(out)

    ref = tv_loss_ref(x, tv_loss_weight=1.0)
    assert jnp.allclose(out, ref, rtol=1e-5, atol=1e-5), (out, ref)

    print("KERNEL_OK")
</pallas_src>

<mosaic_0001>
module attributes {stable_mosaic.version = 11 : i64} {
  func.func @kernel(%arg0: i32, %arg1: i32, %arg2: memref<8x256xf32, #tpu.memory_space<vmem>>, %arg3: memref<1x2x256xf32, #tpu.memory_space<vmem>>, %arg4: memref<8x256xf32, #tpu.memory_space<vmem>>, %arg5: memref<8x256xf32, #tpu.memory_space<vmem>>) attributes {dimension_semantics = [#tpu.dimension_semantics<parallel>, #tpu.dimension_semantics<arbitrary>], iteration_bounds = array<i64: 1, 1>, scalar_prefetch = 0 : i64, scratch_operands = 2 : i64, tpu.core_type = #tpu.core_type<tc>, window_params = [{transform_indices = @transform_0, window_bounds = array<i64: 8, 256>}, {transform_indices = @transform_1, window_bounds = array<i64: 1, 2, 256>}]} {
    %c0_i32 = arith.constant 0 : i32
    %0 = arith.cmpi eq, %arg1, %c0_i32 : i32
    %1 = arith.extui %0 : i1 to i32
    %c0_i32_0 = arith.constant 0 : i32
    %2 = arith.cmpi ne, %1, %c0_i32_0 : i32
    scf.if %2 {
      %cst = arith.constant 0.000000e+00 : f32
      %19 = vector.broadcast %cst : f32 to vector<8x256xf32>
      %c0_12 = arith.constant 0 : index
      %c0_13 = arith.constant 0 : index
      %20 = vector.load %arg4[%c0_12, %c0_13] : memref<8x256xf32, #tpu.memory_space<vmem>>, vector<8x256xf32>
      tpu.vector_store %arg4[%c0_12, %c0_13], %19 {strides = array<i32>} : memref<8x256xf32, #tpu.memory_space<vmem>>, vector<8x256xf32>,
      %cst_14 = arith.constant 0.000000e+00 : f32
      %21 = vector.broadcast %cst_14 : f32 to vector<8x256xf32>
      %c0_15 = arith.constant 0 : index
      %c0_16 = arith.constant 0 : index
      %22 = vector.load %arg5[%c0_15, %c0_16] : memref<8x256xf32, #tpu.memory_space<vmem>>, vector<8x256xf32>
      tpu.vector_store %arg5[%c0_15, %c0_16], %21 {strides = array<i32>} : memref<8x256xf32, #tpu.memory_space<vmem>>, vector<8x256xf32>,
    } else {
    }
    %c0 = arith.constant 0 : index
    %c0_1 = arith.constant 0 : index
    %3 = vector.load %arg2[%c0, %c0_1] : memref<8x256xf32, #tpu.memory_space<vmem>>, vector<8x256xf32>
    %c240_i32 = arith.constant 240 : i32
    %4 = tpu.dynamic_rotate %3 by %c240_i32 dim 1 : vector<8x256xf32>, i32 -> vector<8x256xf32>
    %c255_i32 = arith.constant 255 : i32
    %5 = tpu.dynamic_rotate %3 by %c255_i32 dim 1 : vector<8x256xf32>, i32 -> vector<8x256xf32>
    %6 = arith.subf %4, %3 : vector<8x256xf32>
    %7 = arith.subf %5, %3 : vector<8x256xf32>
    %8 = arith.mulf %6, %6 : vector<8x256xf32>
    %9 = arith.mulf %7, %7 : vector<8x256xf32>
    %c0_2 = arith.constant 0 : index
    %c0_3 = arith.constant 0 : index
    %10 = vector.load %arg4[%c0_2, %c0_3] : memref<8x256xf32, #tpu.memory_space<vmem>>, vector<8x256xf32>
    %11 = arith.addf %10, %8 : vector<8x256xf32>
    %c0_4 = arith.constant 0 : index
    %c0_5 = arith.constant 0 : index
    %12 = vector.load %arg4[%c0_4, %c0_5] : memref<8x256xf32, #tpu.memory_space<vmem>>, vector<8x256xf32>
    tpu.vector_store %arg4[%c0_4, %c0_5], %11 {strides = array<i32>} : memref<8x256xf32, #tpu.memory_space<vmem>>, vector<8x256xf32>,
    %c0_6 = arith.constant 0 : index
    %c0_7 = arith.constant 0 : index
    %13 = vector.load %arg5[%c0_6, %c0_7] : memref<8x256xf32, #tpu.memory_space<vmem>>, vector<8x256xf32>
    %14 = arith.addf %13, %9 : vector<8x256xf32>
    %c0_8 = arith.constant 0 : index
    %c0_9 = arith.constant 0 : index
    %15 = vector.load %arg5[%c0_8, %c0_9] : memref<8x256xf32, #tpu.memory_space<vmem>>, vector<8x256xf32>
    tpu.vector_store %arg5[%c0_8, %c0_9], %14 {strides = array<i32>} : memref<8x256xf32, #tpu.memory_space<vmem>>, vector<8x256xf32>,
    %c0_i32_10 = arith.constant 0 : i32
    %16 = arith.cmpi eq, %arg1, %c0_i32_10 : i32
    %17 = arith.extui %16 : i1 to i32
    %c0_i32_11 = arith.constant 0 : i32
    %18 = arith.cmpi ne, %17, %c0_i32_11 : i32
    scf.if %18 {
      %c0_12 = arith.constant 0 : index
      %c0_13 = arith.constant 0 : index
      %19 = vector.load %arg4[%c0_12, %c0_13] : memref<8x256xf32, #tpu.memory_space<vmem>>, vector<8x256xf32>
      %cst = arith.constant dense<0.000000e+00> : vector<256xf32>
      %20 = vector.multi_reduction <add>, %19, %cst [0] : vector<8x256xf32> to vector<256xf32>
      %21 = vector.shape_cast %20 : vector<256xf32> to vector<1x256xf32>
      %c0_14 = arith.constant 0 : index
      %c0_15 = arith.constant 0 : index
      %c0_16 = arith.constant 0 : index
      %22 = vector.load %arg3[%c0_14, %c0_15, %c0_16] : memref<1x2x256xf32, #tpu.memory_space<vmem>>, vector<1x1x256xf32>
      %23 = vector.shape_cast %22 : vector<1x1x256xf32> to vector<1x256xf32>
      %24 = vector.shape_cast %21 : vector<1x256xf32> to vector<1x1x256xf32>
      tpu.vector_store %arg3[%c0_14, %c0_15, %c0_16], %24 {strides = array<i32>} : memref<1x2x256xf32, #tpu.memory_space<vmem>>, vector<1x1x256xf32>,
      %c0_17 = arith.constant 0 : index
      %c0_18 = arith.constant 0 : index
      %25 = vector.load %arg5[%c0_17, %c0_18] : memref<8x256xf32, #tpu.memory_space<vmem>>, vector<8x256xf32>
      %cst_19 = arith.constant dense<0.000000e+00> : vector<256xf32>
      %26 = vector.multi_reduction <add>, %25, %cst_19 [0] : vector<8x256xf32> to vector<256xf32>
      %27 = vector.shape_cast %26 : vector<256xf32> to vector<1x256xf32>
      %c0_20 = arith.constant 0 : index
      %c1 = arith.constant 1 : index
      %c0_21 = arith.constant 0 : index
      %28 = vector.load %arg3[%c0_20, %c1, %c0_21] : memref<1x2x256xf32, #tpu.memory_space<vmem>>, vector<1x1x256xf32>
      %29 = vector.shape_cast %28 : vector<1x1x256xf32> to vector<1x256xf32>
      %30 = vector.shape_cast %27 : vector<1x256xf32> to vector<1x1x256xf32>
      tpu.vector_store %arg3[%c0_20, %c1, %c0_21], %30 {strides = array<i32>} : memref<1x2x256xf32, #tpu.memory_space<vmem>>, vector<1x1x256xf32>,
    } else {
    }
    return
  }
  func.func @transform_0(%arg0: i32, %arg1: i32) -> (i32, i32) {
    %c1_i32 = arith.constant 1 : i32
    %0 = arith.muli %arg0, %c1_i32 : i32
    %1 = arith.addi %0, %arg1 : i32
    %c0_i32 = arith.constant 0 : i32
    %2 = arith.minsi %1, %c0_i32 : i32
    %c0_i32_0 = arith.constant 0 : i32
    %c0_i32_1 = arith.constant 0 : i32
    return %2, %c0_i32_0 : i32, i32
  }
  func.func @transform_1(%arg0: i32, %arg1: i32) -> (i32, i32, i32) {
    %c0_i32 = arith.constant 0 : i32
    %c0_i32_0 = arith.constant 0 : i32
    %c0_i32_1 = arith.constant 0 : i32
    return %arg0, %c0_i32, %c0_i32_0 : i32, i32, i32
  }
}

</mosaic_0001>

<bundles_post_ra>
// kernel: tpu_custom_call.1
= control target key start
LH: loop header
LB: loop body
LE: loop exit
PB: predicated region body
PF: predicated region fallthrough
CT: control target
= control target key end

     0   :  { %6 = vsyncpa [#allocation5], 0  ;;  %s259_s0 = inlined_call_operand.hbm [shape: f32[8,256], index: 0, kind: input, shape index: {}]   ;;  %s260_s1 = inlined_call_operand.hbm [shape: f32[1,2,256], index: 1, kind: output, shape index: {}]  }
   0x1   :  { %7 = vsyncpa [#allocation6], 0  ;;  %s220_s6 = smov [#allocation4]   ;;  %s172_s10 = scalar_lea.hbm %s259_s0, 256 }
   0x2   :  { %s20_s7 = sshll.u32 %s220_s6, 4  ;;  %p173_p0 = scmp.ne.s32.totalorder %s259_s0, %s172_s10  ;;  %s21_s7 = int_to_ptr.vmem [resolvable:$true] %s20_s7 }
   0x3   :  { %p176_p1 = scmp.lt.u32.totalorder %s172_s10, %s259_s0 }
   0x5   :  { %p178_p2 = pnand %p176_p1, %p173_p0 }
   0x7   :  { %181 = shalt.err (!%p178_p2)
}
   0x8   :  { %s182_s15 = scalar_lea.vmem %s21_s7, 256  ;;  %p187_p4 = scmp.lt.s32.totalorder %s21_s7, %s21_s7 }
   0x9   :  { %p183_p3 = scmp.ne.s32.totalorder %s21_s7, %s182_s15  ;;  %p188_p5 = scmp.lt.s32.totalorder %s182_s15, %s182_s15 }
   0xb   :  { %p189_p6 = por %p188_p5, %p187_p4 }
   0xd   :  { %p190_p7 = pnand %p189_p6, %p183_p3 }
   0xf   :  { %193 = shalt.err (!%p190_p7)
}
  0x10   :  { %23 = dma.hbm_to_vmem [thread:$0]  %s259_s0, 256, %s21_s7, [#allocation5]  }
  0x11   :  { %216 = dma.done.wait [#allocation5], 256  }
  0x12   :  { %217 = vsyncadd [#allocation5], 4294967040  ;;  %v38_v0 = vld [vmem:[#allocation4] sm:$0xff]  ;;  %s221_s18 = smov 127   ;;  %s222_s19 = smov 112   ;;  %v39_v1 = vld [vmem:[#allocation4 + $0x8] sm:$0xff]  ;;  %v44_v2 = vlaneseq }
  0x13   :  { %49 = vrot.lane.b32.xlu1 %v38_v0, %s221_s18  ;;  %40 = vrot.lane.b32.xlu0 %v38_v0, %s222_s19  ;;  %v223_v24 = vmov 1966171168   ;;  %s224_s0 = smov [#allocation7]  }
  0x14   :  { %v45_v3 = vand.u32 127, %v44_v2  ;;  %v97_v25 = vunpack.c.l.s4 %v223_v24  ;;  %v100_v34 = vshrl.u32 %v44_v2, 7  ;;  %s156_s20 = sshll.u32 %s224_s0, 4  ;;  %vm113_vm2 = vcmp.lt.s32.totalorder %v44_v2, 256  ;;  %s157_s20 = int_to_ptr.vmem [resolvable:$true] %s156_s20 }
  0x15   :  { %s194_s21 = scalar_lea.vmem %s157_s20, 64  ;;  %p199_p9 = scmp.lt.s32.totalorder %s157_s20, %s157_s20 }
  0x16   :  { %vm53_vm0 = vcmp.lt.s32.totalorder %v45_v3, 127  ;;  %vm46_vm1 = vcmp.lt.s32.totalorder %v45_v3, 112  ;;  %v98_v35 = vunpack.c.0.s8 %v97_v25  ;;  %p195_p8 = scmp.ne.s32.totalorder %s157_s20, %s194_s21  ;;  %p200_p10 = scmp.lt.s32.totalorder %s194_s21, %s194_s21 }
  0x17   :  { %51 = vrot.lane.b32.xlu1 %v39_v1, %s221_s18  ;;  %42 = vrot.lane.b32.xlu0 %v39_v1, %s222_s19 }
  0x18   :  { %v101_v44 = vsub.s32 %v98_v35, %v100_v34  ;;  %p201_p11 = por %p200_p10, %p199_p9 }
  0x1a   :  { %p202_p12 = pnand %p201_p11, %p195_p8 }
  0x85   :  { %v50_v4 = vpop.permute.xlu1 %49  ;;  %v41_v5 = vpop.permute.xlu0 %40 }
  0x89   :  { %v52_v6 = vpop.permute.xlu1 %51  ;;  %v43_v7 = vpop.permute.xlu0 %42 }
  0x8a   :  { %v54_v8 = vsel %vm53_vm0, %v50_v4, %v52_v6  ;;  %v55_v9 = vsel %vm53_vm0, %v52_v6, %v50_v4  ;;  %v47_v10 = vsel %vm46_vm1, %v41_v5, %v43_v7  ;;  %v48_v11 = vsel %vm46_vm1, %v43_v7, %v41_v5 }
  0x8b   :  { %v58_v12 = vsub.f32 %v54_v8, %v38_v0  ;;  %v59_v13 = vsub.f32 %v55_v9, %v39_v1  ;;  %v56_v14 = vsub.f32 %v47_v10, %v38_v0  ;;  %v57_v15 = vsub.f32 %v48_v11, %v39_v1 }
  0x8d   :  { %v62_v16 = vmul.f32 %v58_v12, %v58_v12  ;;  %v63_v17 = vmul.f32 %v59_v13, %v59_v13  ;;  %v60_v18 = vmul.f32 %v56_v14, %v56_v14  ;;  %v61_v19 = vmul.f32 %v57_v15, %v57_v15 }
  0x8f   :  { %v118_v20 = vrot.slane %v62_v16, 4  ;;  %v124_v21 = vrot.slane %v63_v17, 4  ;;  %v81_v22 = vrot.slane %v60_v18, 4  ;;  %v87_v23 = vrot.slane %v61_v19, 4 }
  0x91   :  { %v119_v26 = vadd.f32 %v118_v20, %v62_v16  ;;  %v125_v27 = vadd.f32 %v124_v21, %v63_v17  ;;  %v82_v28 = vadd.f32 %v81_v22, %v60_v18  ;;  %v88_v29 = vadd.f32 %v87_v23, %v61_v19 }
  0x93   :  { %v120_v30 = vrot.slane %v119_v26, 2  ;;  %v126_v31 = vrot.slane %v125_v27, 2  ;;  %v83_v32 = vrot.slane %v82_v28, 2  ;;  %v89_v33 = vrot.slane %v88_v29, 2 }
  0x95   :  { %v121_v36 = vadd.f32 %v120_v30, %v119_v26  ;;  %v127_v37 = vadd.f32 %v126_v31, %v125_v27  ;;  %v84_v38 = vadd.f32 %v83_v32, %v82_v28  ;;  %v90_v39 = vadd.f32 %v89_v33, %v88_v29 }
  0x97   :  { %v122_v40 = vrot.slane %v121_v36, 1  ;;  %v128_v41 = vrot.slane %v127_v37, 1  ;;  %v85_v42 = vrot.slane %v84_v38, 1  ;;  %v91_v43 = vrot.slane %v90_v39, 1 }
  0x99   :  { %v123_v45 = vadd.f32 %v122_v40, %v121_v36  ;;  %v129_v46 = vadd.f32 %v128_v41, %v127_v37  ;;  %v86_v47 = vadd.f32 %v85_v42, %v84_v38  ;;  %v92_v48 = vadd.f32 %v91_v43, %v90_v39 }
  0x9b   :  { %v132_v49 = vcombine.low %v123_v45, %v129_v46  ;;  %v95_v50 = vcombine.low %v86_v47, %v92_v48 }
  0x9d   :  { %v102_v51 = vrot.slane %v95_v50, %v101_v44  ;;  %v139_v52 = vrot.slane %v132_v49, %v101_v44 }
  0x9f   :  { %v109_v53 = vrot.slane %v102_v51, %v101_v44  ;;  %v146_v54 = vrot.slane %v139_v52, %v101_v44 }
  0xa1   :  { %115 = vst.msk [vmem:[#allocation7] ss:$2 sm:$0x3] %vm113_vm2, %v109_v53  ;;  %149 = vst.msk [vmem:[#allocation7 + $0x1] ss:$2 sm:$0x3] %vm113_vm2, %v146_v54 }
  0xa2   :  { %205 = shalt.err (!%p202_p12)
}
  0xa3   :  { %s206_s24 = scalar_lea.hbm %s260_s1, 64 }
  0xa4   :  { %p207_p13 = scmp.ne.s32.totalorder %s260_s1, %s206_s24  ;;  %p210_p0 = scmp.lt.u32.totalorder %s206_s24, %s260_s1 }
  0xa6   :  { %p212_p1 = pnand %p210_p0, %p207_p13 }
  0xa8   :  { %215 = shalt.err (!%p212_p1)
}
  0xa9   :  { %159 = dma.vmem_to_hbm [thread:$0]  %s157_s20, 64, %s260_s1, [#allocation6]  }
  0xaa   :  { %218 = dma.done.wait [#allocation6], 64  }
  0xab   :  { %219 = vsyncadd [#allocation6], 4294967232 }
  0xac   :  { %163 = vsyncpa [#allocation5], 1 }
  0xad   :  { %164 = vsyncpa [#allocation6], 1 }

</bundles_post_ra>
